<compile_context>
chip_gen: v5e
topology: v5e:2x2
jax: 0.10.0
libtpu: 0.0.40
codegen_flags: <defaults>
</compile_context>

<pallas_src>
import functools

import jax
import jax.numpy as jnp
from jax.experimental import pallas as pl
from jax.experimental.pallas import tpu as pltpu

HIDDEN = 128
FUSED = 2 * HIDDEN        # fused (policy|value) hidden width
OUT_LANES = 128           # lane-dense output slab width
MAX_BATCH_TILE = 256      # batch tile when batch is large


def _round_up(x, m):
    return (x + m - 1) // m * m


# ---------------------------------------------------------------------------
# Kernel
# ---------------------------------------------------------------------------
def _pvnet_kernel(x_ref, w_ref, b_ref, out_ref, *, action_dim):
    A = action_dim
    x = x_ref[...]                                   # (TB, 256) zero-padded obs

    # Fused layer 1: lanes [0:128] = policy hidden, [128:256] = value hidden.
    h = jnp.tanh(jnp.dot(x, w_ref[0], preferred_element_type=jnp.float32)
                 + b_ref[0])
    # Fused layer 2 (block-diagonal).
    h = jnp.tanh(jnp.dot(h, w_ref[1], preferred_element_type=jnp.float32)
                 + b_ref[1])
    # Fused layer 3: policy logits in lanes [0:A], q values in lanes [A:2A].
    o3 = (jnp.dot(h, w_ref[2], preferred_element_type=jnp.float32)
          + b_ref[2])

    logits = o3[:, :A]                               # (TB, A)
    q_value = o3[:, A:2 * A]                         # (TB, A)

    # softmax over the action dim + clamp(max=1-1e-20); the clamp is a no-op
    # in float32 (matches PyTorch float32 semantics) but kept for fidelity.
    m = jnp.max(logits, axis=1, keepdims=True)
    e = jnp.exp(logits - m)
    inv = pl.reciprocal(jnp.sum(e, axis=1, keepdims=True), approx=True)
    policy = jnp.minimum(e * inv, jnp.float32(1.0 - 1e-20))

    value = jnp.sum(policy * q_value, axis=1, keepdims=True)   # (TB, 1)

    # Single lane-dense output slab: [policy | q | value | zero pad] -> 128 lanes.
    tb = x.shape[0]
    pad = jnp.zeros((tb, OUT_LANES - (2 * A + 1)), jnp.float32)
    out_ref[...] = jnp.concatenate([policy, q_value, value, pad], axis=1)


# ---------------------------------------------------------------------------
# Parameter init (PyTorch nn.Linear-style) and host-side packing
# ---------------------------------------------------------------------------
def init_params(key, observation_dim, action_dim):
    """Uniform(-1/sqrt(fan_in), 1/sqrt(fan_in)) init; W stored as (in, out)."""
    def linear(k, fan_in, fan_out):
        kw, kb = jax.random.split(k)
        bound = 1.0 / jnp.sqrt(jnp.float32(fan_in))
        w = jax.random.uniform(kw, (fan_in, fan_out), jnp.float32, -bound, bound)
        b = jax.random.uniform(kb, (fan_out,), jnp.float32, -bound, bound)
        return w, b

    keys = jax.random.split(key, 6)
    pw1, pb1 = linear(keys[0], observation_dim, HIDDEN)
    pw2, pb2 = linear(keys[1], HIDDEN, HIDDEN)
    pw3, pb3 = linear(keys[2], HIDDEN, action_dim)
    vw1, vb1 = linear(keys[3], observation_dim, HIDDEN)
    vw2, vb2 = linear(keys[4], HIDDEN, HIDDEN)
    vw3, vb3 = linear(keys[5], HIDDEN, action_dim)
    return (pw1, pb1, pw2, pb2, pw3, pb3, vw1, vb1, vw2, vb2, vw3, vb3)


def pack_params(params, observation_dim, action_dim):
    """Fuse both heads into one (3,256,256) weight slab + (3,1,256) bias slab."""
    (pw1, pb1, pw2, pb2, pw3, pb3, vw1, vb1, vw2, vb2, vw3, vb3) = params
    A = action_dim
    assert 2 * A + 1 <= OUT_LANES, "action_dim too large for the output slab"

    w = jnp.zeros((3, FUSED, FUSED), jnp.float32)
    w = w.at[0, :observation_dim, :HIDDEN].set(pw1)
    w = w.at[0, :observation_dim, HIDDEN:].set(vw1)
    w = w.at[1, :HIDDEN, :HIDDEN].set(pw2)
    w = w.at[1, HIDDEN:, HIDDEN:].set(vw2)
    w = w.at[2, :HIDDEN, :A].set(pw3)
    w = w.at[2, HIDDEN:, A:2 * A].set(vw3)

    b = jnp.zeros((3, 1, FUSED), jnp.float32)
    b = b.at[0, 0, :HIDDEN].set(pb1)
    b = b.at[0, 0, HIDDEN:].set(vb1)
    b = b.at[1, 0, :HIDDEN].set(pb2)
    b = b.at[1, 0, HIDDEN:].set(vb2)
    b = b.at[2, 0, :A].set(pb3)
    b = b.at[2, 0, A:2 * A].set(vb3)
    return w, b


# ---------------------------------------------------------------------------
# Forward wrapper
# ---------------------------------------------------------------------------
def policy_value_net_forward(observation, packed_params, action_dim):
    w_slab, b_slab = packed_params
    batch, obs_dim = observation.shape
    A = action_dim

    # Batch tiling: one tile for small batches; 256-row tiles (parallel grid,
    # usable by both v7x TensorCores) once the batch grows.
    if batch <= MAX_BATCH_TILE:
        tb = _round_up(batch, 8)
    else:
        tb = MAX_BATCH_TILE
    padded_batch = _round_up(batch, tb)
    grid = (padded_batch // tb,)

    # Lane-dense, zero-padded observation slab (zeros beyond obs_dim / batch).
    x = jnp.zeros((padded_batch, FUSED), jnp.float32)
    x = x.at[:batch, :obs_dim].set(observation.astype(jnp.float32))

    out = pl.pallas_call(
        functools.partial(_pvnet_kernel, action_dim=A),
        out_shape=jax.ShapeDtypeStruct((padded_batch, OUT_LANES), jnp.float32),
        grid=grid,
        in_specs=[
            pl.BlockSpec((tb, FUSED), lambda i: (i, 0)),
            pl.BlockSpec((3, FUSED, FUSED), lambda i: (0, 0, 0)),
            pl.BlockSpec((3, 1, FUSED), lambda i: (0, 0, 0)),
        ],
        out_specs=pl.BlockSpec((tb, OUT_LANES), lambda i: (i, 0)),
        compiler_params=pltpu.CompilerParams(
            dimension_semantics=("parallel",)),
    )(x, w_slab, b_slab)

    policy = out[:batch, :A]
    q_value = out[:batch, A:2 * A]
    value = out[:batch, 2 * A:2 * A + 1]
    return policy, q_value, value


# ---------------------------------------------------------------------------
# Pure-JAX reference (un-fused, mirrors the PyTorch module)
# ---------------------------------------------------------------------------
def _reference_forward(observation, params):
    (pw1, pb1, pw2, pb2, pw3, pb3, vw1, vb1, vw2, vb2, vw3, vb3) = params
    h = jnp.tanh(observation @ pw1 + pb1)
    h = jnp.tanh(h @ pw2 + pb2)
    logits = h @ pw3 + pb3
    policy = jax.nn.softmax(logits, axis=1)
    policy = jnp.minimum(policy, 1.0 - 1e-20)
    g = jnp.tanh(observation @ vw1 + vb1)
    g = jnp.tanh(g @ vw2 + vb2)
    q = g @ vw3 + vb3
    value = jnp.sum(policy * q, axis=1, keepdims=True)
    return policy, q, value


if __name__ == "__main__":
    observation_dim = 4   # CartPole observation
    action_dim = 2        # CartPole actions
    batch = 8

    key = jax.random.PRNGKey(0)
    k_params, k_obs = jax.random.split(key)
    params = init_params(k_params, observation_dim, action_dim)
    packed = pack_params(params, observation_dim, action_dim)
    observation = jax.random.normal(k_obs, (batch, observation_dim), jnp.float32)

    policy, q_value, value = policy_value_net_forward(observation, packed,
                                                      action_dim)
    jax.block_until_ready((policy, q_value, value))

    # Sanity check against a pure-JAX reference on the un-fused parameters.
    ref_policy, ref_q, ref_value = _reference_forward(observation, params)
    # policy/value use the approximate (EUP) reciprocal -> slightly looser tol.
    assert jnp.allclose(policy, ref_policy, atol=2e-3, rtol=2e-3), "policy mismatch"
    assert jnp.allclose(q_value, ref_q, atol=1e-4, rtol=1e-4), "q_value mismatch"
    assert jnp.allclose(value, ref_value, atol=2e-3, rtol=2e-3), "value mismatch"
    assert policy.shape == (batch, action_dim)
    assert q_value.shape == (batch, action_dim)
    assert value.shape == (batch, 1)

    print("KERNEL_OK")
</pallas_src>

<mosaic_0001>
module attributes {stable_mosaic.version = 11 : i64} {
  func.func @_pvnet_kernel(%arg0: i32, %arg1: memref<8x256xf32, #tpu.memory_space<vmem>>, %arg2: memref<3x256x256xf32, #tpu.memory_space<vmem>>, %arg3: memref<3x1x256xf32, #tpu.memory_space<vmem>>, %arg4: memref<8x128xf32, #tpu.memory_space<vmem>>) attributes {dimension_semantics = [#tpu.dimension_semantics<parallel>], iteration_bounds = array<i64: 1>, scalar_prefetch = 0 : i64, scratch_operands = 0 : i64, tpu.core_type = #tpu.core_type<tc>, window_params = [{transform_indices = @transform_0, window_bounds = array<i64: 8, 256>}, {pipeline_mode = #tpu.pipeline_mode<synchronous>, transform_indices = @transform_1, window_bounds = array<i64: 3, 256, 256>}, {pipeline_mode = #tpu.pipeline_mode<synchronous>, transform_indices = @transform_2, window_bounds = array<i64: 3, 1, 256>}, {transform_indices = @transform_3, window_bounds = array<i64: 8, 128>}]} {
    %c0 = arith.constant 0 : index
    %c0_0 = arith.constant 0 : index
    %0 = vector.load %arg1[%c0, %c0_0] : memref<8x256xf32, #tpu.memory_space<vmem>>, vector<8x256xf32>
    %c0_1 = arith.constant 0 : index
    %c0_2 = arith.constant 0 : index
    %c0_3 = arith.constant 0 : index
    %1 = vector.load %arg2[%c0_1, %c0_2, %c0_3] : memref<3x256x256xf32, #tpu.memory_space<vmem>>, vector<1x256x256xf32>
    %2 = vector.shape_cast %1 : vector<1x256x256xf32> to vector<256x256xf32>
    %cst = arith.constant dense<0.000000e+00> : vector<8x256xf32>
    %3 = tpu.matmul %0, %2, %cst {dimension_numbers = #tpu.dot_dimension_numbers<[1], [0], [0], [1], [0, 0, 1, 1], [], []>} : vector<8x256xf32>, vector<256x256xf32>, vector<8x256xf32> -> vector<8x256xf32>
    %c0_4 = arith.constant 0 : index
    %c0_5 = arith.constant 0 : index
    %c0_6 = arith.constant 0 : index
    %4 = vector.load %arg3[%c0_4, %c0_5, %c0_6] : memref<3x1x256xf32, #tpu.memory_space<vmem>>, vector<1x1x256xf32>
    %5 = vector.shape_cast %4 : vector<1x1x256xf32> to vector<1x256xf32>
    %6 = vector.broadcast %5 : vector<1x256xf32> to vector<8x256xf32>
    %7 = arith.addf %3, %6 : vector<8x256xf32>
    %8 = math.tanh %7 : vector<8x256xf32>
    %c1 = arith.constant 1 : index
    %c0_7 = arith.constant 0 : index
    %c0_8 = arith.constant 0 : index
    %9 = vector.load %arg2[%c1, %c0_7, %c0_8] : memref<3x256x256xf32, #tpu.memory_space<vmem>>, vector<1x256x256xf32>
    %10 = vector.shape_cast %9 : vector<1x256x256xf32> to vector<256x256xf32>
    %cst_9 = arith.constant dense<0.000000e+00> : vector<8x256xf32>
    %11 = tpu.matmul %8, %10, %cst_9 {dimension_numbers = #tpu.dot_dimension_numbers<[1], [0], [0], [1], [0, 0, 1, 1], [], []>} : vector<8x256xf32>, vector<256x256xf32>, vector<8x256xf32> -> vector<8x256xf32>
    %c1_10 = arith.constant 1 : index
    %c0_11 = arith.constant 0 : index
    %c0_12 = arith.constant 0 : index
    %12 = vector.load %arg3[%c1_10, %c0_11, %c0_12] : memref<3x1x256xf32, #tpu.memory_space<vmem>>, vector<1x1x256xf32>
    %13 = vector.shape_cast %12 : vector<1x1x256xf32> to vector<1x256xf32>
    %14 = vector.broadcast %13 : vector<1x256xf32> to vector<8x256xf32>
    %15 = arith.addf %11, %14 : vector<8x256xf32>
    %16 = math.tanh %15 : vector<8x256xf32>
    %c2 = arith.constant 2 : index
    %c0_13 = arith.constant 0 : index
    %c0_14 = arith.constant 0 : index
    %17 = vector.load %arg2[%c2, %c0_13, %c0_14] : memref<3x256x256xf32, #tpu.memory_space<vmem>>, vector<1x256x256xf32>
    %18 = vector.shape_cast %17 : vector<1x256x256xf32> to vector<256x256xf32>
    %cst_15 = arith.constant dense<0.000000e+00> : vector<8x256xf32>
    %19 = tpu.matmul %16, %18, %cst_15 {dimension_numbers = #tpu.dot_dimension_numbers<[1], [0], [0], [1], [0, 0, 1, 1], [], []>} : vector<8x256xf32>, vector<256x256xf32>, vector<8x256xf32> -> vector<8x256xf32>
    %c2_16 = arith.constant 2 : index
    %c0_17 = arith.constant 0 : index
    %c0_18 = arith.constant 0 : index
    %20 = vector.load %arg3[%c2_16, %c0_17, %c0_18] : memref<3x1x256xf32, #tpu.memory_space<vmem>>, vector<1x1x256xf32>
    %21 = vector.shape_cast %20 : vector<1x1x256xf32> to vector<1x256xf32>
    %22 = vector.broadcast %21 : vector<1x256xf32> to vector<8x256xf32>
    %23 = arith.addf %19, %22 : vector<8x256xf32>
    %24 = vector.extract_strided_slice %23 {offsets = [0, 0], sizes = [8, 2], strides = [1, 1]} : vector<8x256xf32> to vector<8x2xf32>
    %25 = vector.extract_strided_slice %23 {offsets = [0, 2], sizes = [8, 2], strides = [1, 1]} : vector<8x256xf32> to vector<8x2xf32>
    %cst_19 = arith.constant dense<0xFF800000> : vector<8xf32>
    %26 = vector.multi_reduction <maximumf>, %24, %cst_19 [1] : vector<8x2xf32> to vector<8xf32>
    %27 = vector.shape_cast %26 : vector<8xf32> to vector<8x1xf32>
    %28 = vector.broadcast %27 : vector<8x1xf32> to vector<8x2xf32>
    %29 = arith.subf %24, %28 : vector<8x2xf32>
    %30 = math.exp %29 : vector<8x2xf32>
    %cst_20 = arith.constant dense<0.000000e+00> : vector<8xf32>
    %31 = vector.multi_reduction <add>, %30, %cst_20 [1] : vector<8x2xf32> to vector<8xf32>
    %32 = vector.shape_cast %31 : vector<8xf32> to vector<8x1xf32>
    %33 = tpu.reciprocal %32 {approx = true} : vector<8x1xf32> -> vector<8x1xf32>
    %34 = vector.broadcast %33 : vector<8x1xf32> to vector<8x2xf32>
    %35 = arith.mulf %30, %34 : vector<8x2xf32>
    %cst_21 = arith.constant 1.000000e+00 : f32
    %36 = vector.broadcast %cst_21 : f32 to vector<8x2xf32>
    %37 = arith.minimumf %35, %36 : vector<8x2xf32>
    %38 = arith.mulf %37, %25 : vector<8x2xf32>
    %cst_22 = arith.constant dense<0.000000e+00> : vector<8xf32>
    %39 = vector.multi_reduction <add>, %38, %cst_22 [1] : vector<8x2xf32> to vector<8xf32>
    %40 = vector.shape_cast %39 : vector<8xf32> to vector<8x1xf32>
    %cst_23 = arith.constant 0.000000e+00 : f32
    %41 = vector.broadcast %cst_23 : f32 to vector<8x123xf32>
    %42 = tpu.concatenate %37, %25, %40, %41 in 1 : vector<8x2xf32>, vector<8x2xf32>, vector<8x1xf32>, vector<8x123xf32> -> vector<8x128xf32>
    %c0_24 = arith.constant 0 : index
    %c0_25 = arith.constant 0 : index
    %43 = vector.load %arg4[%c0_24, %c0_25] : memref<8x128xf32, #tpu.memory_space<vmem>>, vector<8x128xf32>
    tpu.vector_store %arg4[%c0_24, %c0_25], %42 {strides = array<i32>} : memref<8x128xf32, #tpu.memory_space<vmem>>, vector<8x128xf32>,
    return
  }
  func.func @transform_0(%arg0: i32) -> (i32, i32) {
    %c0_i32 = arith.constant 0 : i32
    %c0_i32_0 = arith.constant 0 : i32
    return %arg0, %c0_i32 : i32, i32
  }
  func.func @transform_1(%arg0: i32) -> (i32, i32, i32) {
    %c0_i32 = arith.constant 0 : i32
    %c0_i32_0 = arith.constant 0 : i32
    %c0_i32_1 = arith.constant 0 : i32
    %c0_i32_2 = arith.constant 0 : i32
    return %c0_i32, %c0_i32_0, %c0_i32_1 : i32, i32, i32
  }
  func.func @transform_2(%arg0: i32) -> (i32, i32, i32) {
    %c0_i32 = arith.constant 0 : i32
    %c0_i32_0 = arith.constant 0 : i32
    %c0_i32_1 = arith.constant 0 : i32
    %c0_i32_2 = arith.constant 0 : i32
    return %c0_i32, %c0_i32_0, %c0_i32_1 : i32, i32, i32
  }
  func.func @transform_3(%arg0: i32) -> (i32, i32) {
    %c0_i32 = arith.constant 0 : i32
    %c0_i32_0 = arith.constant 0 : i32
    return %arg0, %c0_i32 : i32, i32
  }
}

</mosaic_0001>

<bundles_post_ra>
// kernel: tpu_custom_call.1
= control target key start
LH: loop header
LB: loop body
LE: loop exit
PB: predicated region body
PF: predicated region fallthrough
CT: control target
= control target key end

     0   :  { %8 = vsyncpa [#allocation3], 0  ;;  %s659_s0 = inlined_call_operand.hbm [shape: f32[8,256], index: 0, kind: input, shape index: {}]   ;;  %s660_s1 = inlined_call_operand.hbm [shape: f32[3,256,256], index: 1, kind: input, shape index: {}]   ;;  %s661_s2 = inlined_call_operand.hbm [shape: f32[3,1,256], index: 2, kind: input, shape index: {}]   ;;  %s662_s3 = inlined_call_operand.hbm [shape: f32[8,128], index: 3, kind: output, shape index: {}]  }
   0x1   :  { %9 = vsyncpa [#allocation6], 0  ;;  %s26_s14 = sshll.u32 %s660_s1, 4  ;;  %s27_s14 = int_to_ptr.hbm [resolvable:$true] %s26_s14 }
   0x2   :  { %10 = vsyncpa [#allocation4], 0  ;;  %s614_s15 = smov [#allocation5]   ;;  %s16_s19 = sshll.u32 %s659_s0, 4  ;;  %s17_s19 = int_to_ptr.hbm [resolvable:$true] %s16_s19 }
   0x3   :  { %s28_s16 = sshll.u32 %s614_s15, 4  ;;  %s615_s20 = smov 256   ;;  %s29_s16 = int_to_ptr.vmem [resolvable:$true] %s28_s16 }
   0x4   :  { %s616_s21 = smov 16   ;;  %s617_s22 = smov [#allocation2]  }
   0x5   :  { %34 = dma.hbm_to_vmem [thread:$0]  %s27_s14, 24576, %s29_s16, [#allocation6], %s615_s20, %s615_s20, %s616_s21  }
   0x6   :  { %s18_s23 = sshll.u32 %s617_s22, 4  ;;  %s39_s26 = sshll.u32 %s661_s2, 4  ;;  %s19_s23 = int_to_ptr.vmem [resolvable:$true] %s18_s23  ;;  %s40_s26 = int_to_ptr.hbm [resolvable:$true] %s39_s26 }
   0x7   :  { %21 = dma.hbm_to_vmem [thread:$0]  %s17_s19, 256, %s19_s23, [#allocation3]  }
   0x8   :  { %s618_s1 = smov [#allocation7]   ;;  %s619_s28 = smov 32  }
   0x9   :  { %s41_s27 = sshll.u32 %s618_s1, 4  ;;  %s620_s29 = smov 2   ;;  %s42_s27 = int_to_ptr.vmem [resolvable:$true] %s41_s27 }
   0xa   :  { %47 = dma.hbm_to_vmem [thread:$0]  %s40_s26, 96, %s42_s27, [#allocation6], %s619_s28, %s619_s28, %s620_s29  }
   0xb   :  { %608 = dma.done.wait [#allocation3], 256  }
   0xc   :  { %609 = vsyncadd [#allocation3], 4294967040 }
   0xd   :  { %610 = dma.done.wait [#allocation6], 24672  }
   0xe   :  { %611 = vsyncadd [#allocation6], 4294942624  ;;  %v93_v0 = vld [vmem:[#allocation5 + $0xf8] sm:$0xff]  ;;  %v91_v1 = vld [vmem:[#allocation5 + $0xe8] sm:$0xff]  ;;  %vm446_vm0 = vcmask 15360   ;;  %s621_s0 = smov 126  }
   0xf   :  { %v125_v2 = vld [vmem:[#allocation5 + $0x1f8] sm:$0xff]  ;;  %172 = vmatpush.msra.mxu2 %v93_v0  ;;  %v92_v3 = vld [vmem:[#allocation5 + $0xf0] sm:$0xff]  ;;  %v123_v4 = vld [vmem:[#allocation5 + $0x1e8] sm:$0xff]  ;;  %vm468_vm1 = vcmask 31744   ;;  %s622_s2 = smov [#allocation8]   ;;  %s480_s6 = sshll.u32 %s662_s3, 4  ;;  %s481_s6 = int_to_ptr.hbm [resolvable:$true] %s480_s6 }
  0x10   :  { %192 = vmatpush.msra.mxu3 %v125_v2  ;;  %132 = vmatpush.msra.mxu0 %v92_v3  ;;  %v89_v5 = vld [vmem:[#allocation5 + $0xd8] sm:$0xff]  ;;  %v90_v6 = vld [vmem:[#allocation5 + $0xe0] sm:$0xff]  ;;  %v124_v7 = vld [vmem:[#allocation5 + $0x1f0] sm:$0xff]  ;;  %s478_s30 = sshll.u32 %s622_s2, 4  ;;  %vm470_vm2 = vcmask 39936   ;;  %s479_s30 = int_to_ptr.vmem [resolvable:$true] %s478_s30 }
  0x11   :  { %173 = vmatpush.msra.mxu2 %v91_v1  ;;  %v121_v8 = vld [vmem:[#allocation5 + $0x1d8] sm:$0xff]  ;;  %v88_v9 = vld [vmem:[#allocation5 + $0xd0] sm:$0xff]  ;;  %v122_v10 = vld [vmem:[#allocation5 + $0x1e0] sm:$0xff]  ;;  %152 = vmatpush.msra.mxu1 %v124_v7 }
  0x12   :  { %193 = vmatpush.msra.mxu3 %v123_v4  ;;  %133 = vmatpush.msra.mxu0 %v90_v6  ;;  %v87_v11 = vld [vmem:[#allocation5 + $0xc8] sm:$0xff]  ;;  %v86_v13 = vld [vmem:[#allocation5 + $0xc0] sm:$0xff]  ;;  %v120_v14 = vld [vmem:[#allocation5 + $0x1d0] sm:$0xff] }
  0x13   :  { %v119_v12 = vld [vmem:[#allocation5 + $0x1c8] sm:$0xff]  ;;  %174 = vmatpush.msra.mxu2 %v89_v5  ;;  %153 = vmatpush.msra.mxu1 %v122_v10  ;;  %v85_v15 = vld [vmem:[#allocation5 + $0xb8] sm:$0xff]  ;;  %v84_v17 = vld [vmem:[#allocation5 + $0xb0] sm:$0xff] }
  0x14   :  { %194 = vmatpush.msra.mxu3 %v121_v8  ;;  %134 = vmatpush.msra.mxu0 %v88_v9  ;;  %v117_v16 = vld [vmem:[#allocation5 + $0x1b8] sm:$0xff]  ;;  %v118_v18 = vld [vmem:[#allocation5 + $0x1c0] sm:$0xff]  ;;  %v83_v19 = vld [vmem:[#allocation5 + $0xa8] sm:$0xff] }
  0x15   :  { %175 = vmatpush.msra.mxu2 %v87_v11  ;;  %154 = vmatpush.msra.mxu1 %v120_v14  ;;  %v115_v20 = vld [vmem:[#allocation5 + $0x1a8] sm:$0xff]  ;;  %v82_v21 = vld [vmem:[#allocation5 + $0xa0] sm:$0xff]  ;;  %v116_v22 = vld [vmem:[#allocation5 + $0x1b0] sm:$0xff] }
  0x16   :  { %195 = vmatpush.msra.mxu3 %v119_v12  ;;  %135 = vmatpush.msra.mxu0 %v86_v13  ;;  %v81_v23 = vld [vmem:[#allocation5 + $0x98] sm:$0xff]  ;;  %v80_v25 = vld [vmem:[#allocation5 + $0x90] sm:$0xff]  ;;  %v114_v26 = vld [vmem:[#allocation5 + $0x1a0] sm:$0xff] }
  0x17   :  { %176 = vmatpush.msra.mxu2 %v85_v15  ;;  %155 = vmatpush.msra.mxu1 %v118_v18  ;;  %v113_v24 = vld [vmem:[#allocation5 + $0x198] sm:$0xff]  ;;  %v79_v27 = vld [vmem:[#allocation5 + $0x88] sm:$0xff]  ;;  %v78_v29 = vld [vmem:[#allocation5 + $0x80] sm:$0xff] }
  0x18   :  { %196 = vmatpush.msra.mxu3 %v117_v16  ;;  %136 = vmatpush.msra.mxu0 %v84_v17  ;;  %v111_v28 = vld [vmem:[#allocation5 + $0x188] sm:$0xff]  ;;  %v112_v30 = vld [vmem:[#allocation5 + $0x190] sm:$0xff]  ;;  %v77_v31 = vld [vmem:[#allocation5 + $0x78] sm:$0xff] }
  0x19   :  { %177 = vmatpush.msra.mxu2 %v83_v19  ;;  %156 = vmatpush.msra.mxu1 %v116_v22  ;;  %v109_v32 = vld [vmem:[#allocation5 + $0x178] sm:$0xff]  ;;  %v76_v33 = vld [vmem:[#allocation5 + $0x70] sm:$0xff]  ;;  %v110_v34 = vld [vmem:[#allocation5 + $0x180] sm:$0xff] }
  0x1a   :  { %197 = vmatpush.msra.mxu3 %v115_v20  ;;  %137 = vmatpush.msra.mxu0 %v82_v21  ;;  %v75_v35 = vld [vmem:[#allocation5 + $0x68] sm:$0xff]  ;;  %v74_v37 = vld [vmem:[#allocation5 + $0x60] sm:$0xff]  ;;  %v108_v38 = vld [vmem:[#allocation5 + $0x170] sm:$0xff] }
  0x1b   :  { %178 = vmatpush.msra.mxu2 %v81_v23  ;;  %157 = vmatpush.msra.mxu1 %v114_v26  ;;  %v107_v36 = vld [vmem:[#allocation5 + $0x168] sm:$0xff]  ;;  %v73_v39 = vld [vmem:[#allocation5 + $0x58] sm:$0xff]  ;;  %v72_v41 = vld [vmem:[#allocation5 + $0x50] sm:$0xff] }
  0x1c   :  { %198 = vmatpush.msra.mxu3 %v113_v24  ;;  %138 = vmatpush.msra.mxu0 %v80_v25  ;;  %v105_v40 = vld [vmem:[#allocation5 + $0x158] sm:$0xff]  ;;  %v106_v42 = vld [vmem:[#allocation5 + $0x160] sm:$0xff]  ;;  %v71_v43 = vld [vmem:[#allocation5 + $0x48] sm:$0xff] }
  0x1d   :  { %179 = vmatpush.msra.mxu2 %v79_v27  ;;  %158 = vmatpush.msra.mxu1 %v112_v30  ;;  %v103_v44 = vld [vmem:[#allocation5 + $0x148] sm:$0xff]  ;;  %v70_v45 = vld [vmem:[#allocation5 + $0x40] sm:$0xff]  ;;  %v104_v46 = vld [vmem:[#allocation5 + $0x150] sm:$0xff] }
  0x1e   :  { %199 = vmatpush.msra.mxu3 %v111_v28  ;;  %139 = vmatpush.msra.mxu0 %v78_v29  ;;  %v69_v47 = vld [vmem:[#allocation5 + $0x38] sm:$0xff]  ;;  %v68_v49 = vld [vmem:[#allocation5 + $0x30] sm:$0xff]  ;;  %v102_v50 = vld [vmem:[#allocation5 + $0x140] sm:$0xff] }
  0x1f   :  { %180 = vmatpush.msra.mxu2 %v77_v31  ;;  %159 = vmatpush.msra.mxu1 %v110_v34  ;;  %v101_v48 = vld [vmem:[#allocation5 + $0x138] sm:$0xff]  ;;  %v67_v51 = vld [vmem:[#allocation5 + $0x28] sm:$0xff]  ;;  %v66_v53 = vld [vmem:[#allocation5 + $0x20] sm:$0xff] }
  0x20   :  { %200 = vmatpush.msra.mxu3 %v109_v32  ;;  %140 = vmatpush.msra.mxu0 %v76_v33  ;;  %v99_v52 = vld [vmem:[#allocation5 + $0x128] sm:$0xff]  ;;  %v100_v54 = vld [vmem:[#allocation5 + $0x130] sm:$0xff]  ;;  %v65_v55 = vld [vmem:[#allocation5 + $0x18] sm:$0xff] }
  0x21   :  { %181 = vmatpush.msra.mxu2 %v75_v35  ;;  %160 = vmatpush.msra.mxu1 %v108_v38  ;;  %v97_v56 = vld [vmem:[#allocation5 + $0x118] sm:$0xff]  ;;  %v64_v57 = vld [vmem:[#allocation5 + $0x10] sm:$0xff]  ;;  %v98_v58 = vld [vmem:[#allocation5 + $0x120] sm:$0xff] }
  0x22   :  { %201 = vmatpush.msra.mxu3 %v107_v36  ;;  %141 = vmatpush.msra.mxu0 %v74_v37  ;;  %v63_v59 = vld [vmem:[#allocation5 + $0x8] sm:$0xff]  ;;  %v60_v61 = vld [vmem:[#allocation2] sm:$0xff]  ;;  %v61_v62 = vld [vmem:[#allocation2 + $0x8] sm:$0xff] }
  0x23   :  { %182 = vmatpush.msra.mxu2 %v73_v39  ;;  %161 = vmatpush.msra.mxu1 %v106_v42  ;;  %v95_v60 = vld [vmem:[#allocation5 + $0x108] sm:$0xff]  ;;  %v62_v63 = vld [vmem:[#allocation5] sm:$0xff]  ;;  %v96_v0 = vld [vmem:[#allocation5 + $0x110] sm:$0xff] }
  0x24   :  { %202 = vmatpush.msra.mxu3 %v105_v40  ;;  %142 = vmatpush.msra.mxu0 %v72_v41  ;;  %v246_v1 = vld [vmem:[#allocation5 + $0x2f8] sm:$0xff]  ;;  %v94_v2 = vld [vmem:[#allocation5 + $0x100] sm:$0xff]  ;;  %v245_v3 = vld [vmem:[#allocation5 + $0x2f0] sm:$0xff] }
  0x25   :  { %183 = vmatpush.msra.mxu2 %v71_v43  ;;  %162 = vmatpush.msra.mxu1 %v104_v46  ;;  %v244_v4 = vld [vmem:[#allocation5 + $0x2e8] sm:$0xff]  ;;  %v243_v5 = vld [vmem:[#allocation5 + $0x2e0] sm:$0xff]  ;;  %v277_v6 = vld [vmem:[#allocation5 + $0x3f0] sm:$0xff] }
  0x26   :  { %203 = vmatpush.msra.mxu3 %v103_v44  ;;  %143 = vmatpush.msra.mxu0 %v70_v45  ;;  %v278_v7 = vld [vmem:[#allocation5 + $0x3f8] sm:$0xff]  ;;  %v241_v9 = vld [vmem:[#allocation5 + $0x2d0] sm:$0xff]  ;;  %v275_v10 = vld [vmem:[#allocation5 + $0x3e0] sm:$0xff] }
  0x27   :  { %184 = vmatpush.msra.mxu2 %v69_v47  ;;  %163 = vmatpush.msra.mxu1 %v102_v50  ;;  %v242_v8 = vld [vmem:[#allocation5 + $0x2d8] sm:$0xff]  ;;  %v276_v11 = vld [vmem:[#allocation5 + $0x3e8] sm:$0xff]  ;;  %v239_v13 = vld [vmem:[#allocation5 + $0x2c0] sm:$0xff] }
  0x28   :  { %204 = vmatpush.msra.mxu3 %v101_v48  ;;  %144 = vmatpush.msra.mxu0 %v68_v49  ;;  %v240_v12 = vld [vmem:[#allocation5 + $0x2c8] sm:$0xff]  ;;  %v273_v14 = vld [vmem:[#allocation5 + $0x3d0] sm:$0xff]  ;;  %v274_v15 = vld [vmem:[#allocation5 + $0x3d8] sm:$0xff] }
  0x29   :  { %185 = vmatpush.msra.mxu2 %v67_v51  ;;  %164 = vmatpush.msra.mxu1 %v100_v54  ;;  %v238_v16 = vld [vmem:[#allocation5 + $0x2b8] sm:$0xff]  ;;  %v237_v17 = vld [vmem:[#allocation5 + $0x2b0] sm:$0xff]  ;;  %v271_v18 = vld [vmem:[#allocation5 + $0x3c0] sm:$0xff] }
  0x2a   :  { %205 = vmatpush.msra.mxu3 %v99_v52  ;;  %145 = vmatpush.msra.mxu0 %v66_v53  ;;  %v272_v19 = vld [vmem:[#allocation5 + $0x3c8] sm:$0xff]  ;;  %v235_v21 = vld [vmem:[#allocation5 + $0x2a0] sm:$0xff]  ;;  %v269_v22 = vld [vmem:[#allocation5 + $0x3b0] sm:$0xff] }
  0x2b   :  { %186 = vmatpush.msra.mxu2 %v65_v55  ;;  %165 = vmatpush.msra.mxu1 %v98_v58  ;;  %v236_v20 = vld [vmem:[#allocation5 + $0x2a8] sm:$0xff]  ;;  %v270_v23 = vld [vmem:[#allocation5 + $0x3b8] sm:$0xff]  ;;  %v233_v25 = vld [vmem:[#allocation5 + $0x290] sm:$0xff] }
  0x2c   :  { %206 = vmatpush.msra.mxu3 %v97_v56  ;;  %146 = vmatpush.msra.mxu0 %v64_v57  ;;  %v234_v24 = vld [vmem:[#allocation5 + $0x298] sm:$0xff]  ;;  %v267_v26 = vld [vmem:[#allocation5 + $0x3a0] sm:$0xff]  ;;  %v268_v27 = vld [vmem:[#allocation5 + $0x3a8] sm:$0xff] }
  0x2d   :  { %187 = vmatpush.msra.mxu2 %v63_v59  ;;  %166 = vmatpush.msra.mxu1 %v96_v0  ;;  %v232_v28 = vld [vmem:[#allocation5 + $0x288] sm:$0xff]  ;;  %v231_v29 = vld [vmem:[#allocation5 + $0x280] sm:$0xff]  ;;  %v265_v30 = vld [vmem:[#allocation5 + $0x390] sm:$0xff] }
  0x2e   :  { %207 = vmatpush.msra.mxu3 %v95_v60  ;;  %188 = vmatmul.f32.vlgmr.msra.gmra.mxu2 %v60_v61  ;;  %v266_v31 = vld [vmem:[#allocation5 + $0x398] sm:$0xff]  ;;  %v229_v33 = vld [vmem:[#allocation5 + $0x270] sm:$0xff]  ;;  %v263_v34 = vld [vmem:[#allocation5 + $0x380] sm:$0xff] }
  0x2f   :  { %208 = vmatmul.f32.vlgmr.msra.gmra.mxu3 %v61_v62  ;;  %147 = vmatpush.msra.mxu0 %v62_v63  ;;  %v230_v32 = vld [vmem:[#allocation5 + $0x278] sm:$0xff]  ;;  %v264_v35 = vld [vmem:[#allocation5 + $0x388] sm:$0xff]  ;;  %v227_v37 = vld [vmem:[#allocation5 + $0x260] sm:$0xff] }
  0x30   :  { %148 = vmatmul.f32.vlgmr.msra.gmra.mxu0 %v60_v61  ;;  %326 = vmatpush.msrb.mxu2 %v246_v1  ;;  %v228_v36 = vld [vmem:[#allocation5 + $0x268] sm:$0xff]  ;;  %v261_v38 = vld [vmem:[#allocation5 + $0x370] sm:$0xff]  ;;  %v262_v39 = vld [vmem:[#allocation5 + $0x378] sm:$0xff] }
  0x31   :  { %167 = vmatpush.msra.mxu1 %v94_v2  ;;  %286 = vmatpush.msrb.mxu0 %v245_v3  ;;  %v225_v40 = vld [vmem:[#allocation5 + $0x250] sm:$0xff]  ;;  %v259_v41 = vld [vmem:[#allocation5 + $0x360] sm:$0xff]  ;;  %v226_v42 = vld [vmem:[#allocation5 + $0x258] sm:$0xff] }
  0x32   :  { %168 = vmatmul.f32.vlgmr.msra.gmra.mxu1 %v61_v62  ;;  %327 = vmatpush.msrb.mxu2 %v244_v4  ;;  %v260_v43 = vld [vmem:[#allocation5 + $0x368] sm:$0xff]  ;;  %v223_v44 = vld [vmem:[#allocation5 + $0x240] sm:$0xff]  ;;  %v257_v45 = vld [vmem:[#allocation5 + $0x350] sm:$0xff] }
  0x33   :  { %287 = vmatpush.msrb.mxu0 %v243_v5  ;;  %306 = vmatpush.msrb.mxu1 %v277_v6  ;;  %v224_v46 = vld [vmem:[#allocation5 + $0x248] sm:$0xff]  ;;  %v258_v47 = vld [vmem:[#allocation5 + $0x358] sm:$0xff]  ;;  %v221_v48 = vld [vmem:[#allocation5 + $0x230] sm:$0xff] }
  0x34   :  { %346 = vmatpush.msrb.mxu3 %v278_v7  ;;  %328 = vmatpush.msrb.mxu2 %v242_v8  ;;  %v255_v49 = vld [vmem:[#allocation5 + $0x340] sm:$0xff]  ;;  %v222_v50 = vld [vmem:[#allocation5 + $0x238] sm:$0xff]  ;;  %v256_v51 = vld [vmem:[#allocation5 + $0x348] sm:$0xff] }
  0x35   :  { %288 = vmatpush.msrb.mxu0 %v241_v9  ;;  %307 = vmatpush.msrb.mxu1 %v275_v10  ;;  %v219_v52 = vld [vmem:[#allocation5 + $0x220] sm:$0xff]  ;;  %v253_v53 = vld [vmem:[#allocation5 + $0x330] sm:$0xff]  ;;  %v220_v54 = vld [vmem:[#allocation5 + $0x228] sm:$0xff] }
  0x36   :  { %347 = vmatpush.msrb.mxu3 %v276_v11  ;;  %329 = vmatpush.msrb.mxu2 %v240_v12  ;;  %v254_v55 = vld [vmem:[#allocation5 + $0x338] sm:$0xff]  ;;  %v217_v56 = vld [vmem:[#allocation5 + $0x210] sm:$0xff]  ;;  %v251_v57 = vld [vmem:[#allocation5 + $0x320] sm:$0xff] }
  0x37   :  { %289 = vmatpush.msrb.mxu0 %v239_v13  ;;  %308 = vmatpush.msrb.mxu1 %v273_v14  ;;  %v218_v58 = vld [vmem:[#allocation5 + $0x218] sm:$0xff]  ;;  %v252_v59 = vld [vmem:[#allocation5 + $0x328] sm:$0xff]  ;;  %v215_v60 = vld [vmem:[#allocation5 + $0x200] sm:$0xff] }
  0x38   :  { %348 = vmatpush.msrb.mxu3 %v274_v15  ;;  %330 = vmatpush.msrb.mxu2 %v238_v16  ;;  %v249_v61 = vld [vmem:[#allocation5 + $0x310] sm:$0xff]  ;;  %v216_v62 = vld [vmem:[#allocation5 + $0x208] sm:$0xff]  ;;  %v250_v63 = vld [vmem:[#allocation5 + $0x318] sm:$0xff] }
  0x39   :  { %290 = vmatpush.msrb.mxu0 %v237_v17  ;;  %309 = vmatpush.msrb.mxu1 %v271_v18  ;;  %v247_v0 = vld [vmem:[#allocation5 + $0x300] sm:$0xff]  ;;  %v248_v1 = vld [vmem:[#allocation5 + $0x308] sm:$0xff]  ;;  %v384_v2 = vld [vmem:[#allocation5 + $0x4f0] sm:$0xff] }
  0x3a   :  { %349 = vmatpush.msrb.mxu3 %v272_v19  ;;  %331 = vmatpush.msrb.mxu2 %v236_v20  ;;  %v383_v3 = vld [vmem:[#allocation5 + $0x4e0] sm:$0xff]  ;;  %v400_v4 = vld [vmem:[#allocation5 + $0x5f0] sm:$0xff] }
  0x3b   :  { %291 = vmatpush.msrb.mxu0 %v235_v21  ;;  %310 = vmatpush.msrb.mxu1 %v269_v22  ;;  %v382_v5 = vld [vmem:[#allocation5 + $0x4d0] sm:$0xff]  ;;  %v399_v6 = vld [vmem:[#allocation5 + $0x5e0] sm:$0xff] }
  0x3c   :  { %350 = vmatpush.msrb.mxu3 %v270_v23  ;;  %332 = vmatpush.msrb.mxu2 %v234_v24  ;;  %v398_v7 = vld [vmem:[#allocation5 + $0x5d0] sm:$0xff]  ;;  %v381_v8 = vld [vmem:[#allocation5 + $0x4c0] sm:$0xff] }
  0x3d   :  { %292 = vmatpush.msrb.mxu0 %v233_v25  ;;  %311 = vmatpush.msrb.mxu1 %v267_v26  ;;  %v397_v9 = vld [vmem:[#allocation5 + $0x5c0] sm:$0xff]  ;;  %v380_v10 = vld [vmem:[#allocation5 + $0x4b0] sm:$0xff] }
  0x3e   :  { %351 = vmatpush.msrb.mxu3 %v268_v27  ;;  %333 = vmatpush.msrb.mxu2 %v232_v28  ;;  %v396_v11 = vld [vmem:[#allocation5 + $0x5b0] sm:$0xff]  ;;  %v379_v12 = vld [vmem:[#allocation5 + $0x4a0] sm:$0xff] }
  0x3f   :  { %293 = vmatpush.msrb.mxu0 %v231_v29  ;;  %312 = vmatpush.msrb.mxu1 %v265_v30  ;;  %v395_v13 = vld [vmem:[#allocation5 + $0x5a0] sm:$0xff]  ;;  %v378_v15 = vld [vmem:[#allocation5 + $0x490] sm:$0xff] }
  0x40   :  { %352 = vmatpush.msrb.mxu3 %v266_v31  ;;  %334 = vmatpush.msrb.mxu2 %v230_v32  ;;  %v126_v14 = vld [vmem:[#allocation7] sm:$0x3]  ;;  %v394_v16 = vld [vmem:[#allocation5 + $0x590] sm:$0xff] }
  0x41   :  { %294 = vmatpush.msrb.mxu0 %v229_v33  ;;  %313 = vmatpush.msrb.mxu1 %v263_v34  ;;  %v377_v17 = vld [vmem:[#allocation5 + $0x480] sm:$0xff]  ;;  %v128_v18 = vperm.slane %v126_v14, 0  ;;  %v376_v19 = vld [vmem:[#allocation5 + $0x470] sm:$0xff]  ;;  %v129_v23 = vperm.slane %v126_v14, 1 }
  0x42   :  { %353 = vmatpush.msrb.mxu3 %v264_v35  ;;  %335 = vmatpush.msrb.mxu2 %v228_v36  ;;  %v375_v21 = vld [vmem:[#allocation5 + $0x460] sm:$0xff]  ;;  %v374_v32 = vld [vmem:[#allocation5 + $0x450] sm:$0xff] }
  0x43   :  { %295 = vmatpush.msrb.mxu0 %v227_v37  ;;  %314 = vmatpush.msrb.mxu1 %v261_v38  ;;  %v393_v33 = vld [vmem:[#allocation5 + $0x580] sm:$0xff]  ;;  %v392_v35 = vld [vmem:[#allocation5 + $0x570] sm:$0xff] }
  0x44   :  { %354 = vmatpush.msrb.mxu3 %v262_v39  ;;  %336 = vmatpush.msrb.mxu2 %v226_v42  ;;  %v373_v34 = vld [vmem:[#allocation5 + $0x440] sm:$0xff]  ;;  %v372_v36 = vld [vmem:[#allocation5 + $0x430] sm:$0xff] }
  0x45   :  { %296 = vmatpush.msrb.mxu0 %v225_v40  ;;  %315 = vmatpush.msrb.mxu1 %v259_v41  ;;  %v391_v37 = vld [vmem:[#allocation5 + $0x560] sm:$0xff]  ;;  %v390_v39 = vld [vmem:[#allocation5 + $0x550] sm:$0xff] }
  0x46   :  { %355 = vmatpush.msrb.mxu3 %v260_v43  ;;  %337 = vmatpush.msrb.mxu2 %v224_v46  ;;  %v371_v38 = vld [vmem:[#allocation5 + $0x420] sm:$0xff]  ;;  %v370_v40 = vld [vmem:[#allocation5 + $0x410] sm:$0xff] }
  0x47   :  { %297 = vmatpush.msrb.mxu0 %v223_v44  ;;  %316 = vmatpush.msrb.mxu1 %v257_v45  ;;  %v389_v41 = vld [vmem:[#allocation5 + $0x540] sm:$0xff]  ;;  %v388_v43 = vld [vmem:[#allocation5 + $0x530] sm:$0xff] }
  0x48   :  { %356 = vmatpush.msrb.mxu3 %v258_v47  ;;  %338 = vmatpush.msrb.mxu2 %v222_v50  ;;  %v369_v42 = vld [vmem:[#allocation5 + $0x400] sm:$0xff]  ;;  %v386_v45 = vld [vmem:[#allocation5 + $0x510] sm:$0xff] }
  0x49   :  { %298 = vmatpush.msrb.mxu0 %v221_v48  ;;  %317 = vmatpush.msrb.mxu1 %v255_v49  ;;  %v387_v44 = vld [vmem:[#allocation5 + $0x520] sm:$0xff] }
  0x4a   :  { %357 = vmatpush.msrb.mxu3 %v256_v51  ;;  %339 = vmatpush.msrb.mxu2 %v220_v54  ;;  %v385_v46 = vld [vmem:[#allocation5 + $0x500] sm:$0xff] }
  0x4b   :  { %299 = vmatpush.msrb.mxu0 %v219_v52  ;;  %318 = vmatpush.msrb.mxu1 %v253_v53  ;;  %v280_v47 = vld [vmem:[#allocation7 + $0x2] sm:$0x3] }
  0x4c   :  { %358 = vmatpush.msrb.mxu3 %v254_v55  ;;  %340 = vmatpush.msrb.mxu2 %v218_v58  ;;  %v282_v48 = vperm.slane %v280_v47, 0  ;;  %v283_v51 = vperm.slane %v280_v47, 1 }
  0x4d   :  { %300 = vmatpush.msrb.mxu0 %v217_v56  ;;  %319 = vmatpush.msrb.mxu1 %v251_v57 }
  0x4e   :  { %359 = vmatpush.msrb.mxu3 %v252_v59  ;;  %341 = vmatpush.msrb.mxu2 %v216_v62 }
  0x4f   :  { %301 = vmatpush.msrb.mxu0 %v215_v60  ;;  %320 = vmatpush.msrb.mxu1 %v249_v61  ;;  %v402_v60 = vld [vmem:[#allocation7 + $0x4] sm:$0x3] }
  0x50   :  { %360 = vmatpush.msrb.mxu3 %v250_v63  ;;  %v404_v61 = vperm.slane %v402_v60, 0 }
  0x51   :  { %321 = vmatpush.msrb.mxu1 %v247_v0  ;;  %406 = vmatpush.msra.mxu0 %v384_v2 }
  0x52   :  { %361 = vmatpush.msrb.mxu3 %v248_v1 }
  0x53   :  { %426 = vmatpush.msra.mxu1 %v400_v4  ;;  %407 = vmatpush.msra.mxu0 %v383_v3 }
  0x55   :  { %427 = vmatpush.msra.mxu1 %v399_v6  ;;  %408 = vmatpush.msra.mxu0 %v382_v5 }
  0x57   :  { %428 = vmatpush.msra.mxu1 %v398_v7  ;;  %409 = vmatpush.msra.mxu0 %v381_v8 }
  0x59   :  { %429 = vmatpush.msra.mxu1 %v397_v9  ;;  %410 = vmatpush.msra.mxu0 %v380_v10 }
  0x5b   :  { %430 = vmatpush.msra.mxu1 %v396_v11  ;;  %411 = vmatpush.msra.mxu0 %v379_v12 }
  0x5d   :  { %431 = vmatpush.msra.mxu1 %v395_v13  ;;  %412 = vmatpush.msra.mxu0 %v378_v15 }
  0x5f   :  { %432 = vmatpush.msra.mxu1 %v394_v16  ;;  %413 = vmatpush.msra.mxu0 %v377_v17 }
  0x61   :  { %414 = vmatpush.msra.mxu0 %v376_v19  ;;  %433 = vmatpush.msra.mxu1 %v393_v33 }
  0x63   :  { %415 = vmatpush.msra.mxu0 %v375_v21  ;;  %434 = vmatpush.msra.mxu1 %v392_v35 }
  0x65   :  { %416 = vmatpush.msra.mxu0 %v374_v32  ;;  %435 = vmatpush.msra.mxu1 %v391_v37 }
  0x67   :  { %417 = vmatpush.msra.mxu0 %v373_v34  ;;  %436 = vmatpush.msra.mxu1 %v390_v39 }
  0x69   :  { %418 = vmatpush.msra.mxu0 %v372_v36  ;;  %437 = vmatpush.msra.mxu1 %v389_v41 }
  0x6b   :  { %419 = vmatpush.msra.mxu0 %v371_v38  ;;  %438 = vmatpush.msra.mxu1 %v388_v43 }
  0x6d   :  { %420 = vmatpush.msra.mxu0 %v370_v40  ;;  %439 = vmatpush.msra.mxu1 %v387_v44 }
  0x6f   :  { %421 = vmatpush.msra.mxu0 %v369_v42  ;;  %440 = vmatpush.msra.mxu1 %v386_v45 }
  0x71   :  { %441 = vmatpush.msra.mxu1 %v385_v46 }
  0xad   :  { %v149_v20 = vpop.f32.mrf.mxu0 }
  0xae   :  { %v150_v22 = vadd.f32 %v149_v20, %v128_v18 }
  0xaf   :  { %v169_v24 = vpop.f32.mrf.mxu1 }
  0xb0   :  { %v170_v25 = vadd.f32 %v169_v24, %v150_v22 }
  0xb1   :  { %v189_v26 = vpop.f32.mrf.mxu2 }
  0xb2   :  { %v209_v27 = vpop.f32.mrf.mxu3  ;;  %500 = vtanh.f32 %v170_v25  ;;  %v190_v28 = vadd.f32 %v189_v26, %v129_v23 }
  0xb4   :  { %v210_v29 = vadd.f32 %v209_v27, %v190_v28 }
  0xb6   :  { %502 = vtanh.f32 %v210_v29 }
  0xb8   :  { %v501_v30 = vpop.eup %500 }
  0xb9   :  { %302 = vmatmul.f32.vlgmr.msrb.gmra.mxu0 %v501_v30  ;;  %342 = vmatmul.f32.vlgmr.msrb.gmra.mxu2 %v501_v30 }
  0xbc   :  { %v503_v31 = vpop.eup %502 }
  0xbd   :  { %322 = vmatmul.f32.vlgmr.msrb.gmra.mxu1 %v503_v31  ;;  %362 = vmatmul.f32.vlgmr.msrb.gmra.mxu3 %v503_v31 }
 0x136   :  { %v303_v49 = vpop.f32.mrf.mxu0 }
 0x137   :  { %v304_v50 = vadd.f32 %v303_v49, %v282_v48 }
 0x13a   :  { %v323_v52 = vpop.f32.mrf.mxu1 }
 0x13b   :  { %v324_v53 = vadd.f32 %v323_v52, %v304_v50 }
 0x13c   :  { %v343_v54 = vpop.f32.mrf.mxu2 }
 0x13d   :  { %504 = vtanh.f32 %v324_v53  ;;  %v344_v55 = vadd.f32 %v343_v54, %v283_v51 }
 0x140   :  { %v363_v56 = vpop.f32.mrf.mxu3 }
 0x141   :  { %v364_v57 = vadd.f32 %v363_v56, %v344_v55 }
 0x143   :  { %v505_v58 = vpop.eup %504  ;;  %506 = vtanh.f32 %v364_v57 }
 0x144   :  { %422 = vmatmul.f32.vlgmr.msra.gmra.mxu0 %v505_v58 }
 0x149   :  { %v507_v59 = vpop.eup %506 }
 0x14a   :  { %442 = vmatmul.f32.vlgmr.msra.gmra.mxu1 %v507_v59 }
 0x1c1   :  { %v423_v62 = vpop.f32.mrf.mxu0 }
 0x1c2   :  { %v424_v63 = vadd.f32 %v423_v62, %v404_v61 }
 0x1c7   :  { %v443_v0 = vpop.f32.mrf.mxu1 }
 0x1c8   :  { %v444_v1 = vadd.f32 %v443_v0, %v424_v63 }
 0x1ca   :  { %460 = vrot.lane.b32.xlu1 %v444_v1, %s621_s0  ;;  %v447_v2 = vsel %vm446_vm0, %v444_v1, -inf }
 0x1cb   :  { %448 = vmax.xlane.f32.xlu0 %v447_v2 }
 0x23c   :  { %v461_v12 = vpop.permute.xlu1 %460 }
 0x23e   :  { %v449_v3 = vpop.xlane.xlu0 %448 }
 0x23f   :  { %v450_v4 = vsub.f32 %v444_v1, %v449_v3 }
 0x241   :  { %v451_v5 = vmul.f32 1.442695, %v450_v4 }
 0x243   :  { %508 = vpow2.f32 %v451_v5 }
 0x249   :  { %v509_v6 = vpop.eup %508 }
 0x24a   :  { %v453_v7 = vsel %vm446_vm0, %v509_v6, 0.0 }
 0x24b   :  { %454 = vadd.xlane.f32.xlu0 %v453_v7 }
 0x2be   :  { %v455_v8 = vpop.xlane.xlu0 %454 }
 0x2bf   :  { %510 = vrcp.f32 %v455_v8 }
 0x2c5   :  { %v511_v9 = vpop.eup %510 }
 0x2c6   :  { %v457_v10 = vmul.f32 %v511_v9, %v509_v6 }
 0x2c8   :  { %v458_v11 = vmin.f32 %v457_v10, 1.0 }
 0x2ca   :  { %v463_v13 = vmul.f32 %v461_v12, %v458_v11  ;;  %v467_v15 = vsel %vm446_vm0, %v458_v11, %v444_v1 }
 0x2cc   :  { %v464_v14 = vsel %vm446_vm0, %v463_v13, 0.0 }
 0x2cd   :  { %465 = vadd.xlane.f32.xlu1 %v464_v14 }
 0x340   :  { %v466_v16 = vpop.xlane.xlu1 %465 }
 0x341   :  { %v469_v17 = vsel %vm468_vm1, %v467_v15, %v466_v16 }
 0x342   :  { %v471_v18 = vsel %vm470_vm2, %v469_v17, 0.0 }
 0x343   :  { %472 = vst [vmem:[#allocation8] sm:$0xff] %v471_v18 }
 0x344   :  { %483 = dma.vmem_to_hbm [thread:$0]  %s479_s30, 128, %s481_s6, [#allocation4]  }
 0x345   :  { %612 = dma.done.wait [#allocation4], 128  }
 0x346   :  { %613 = vsyncadd [#allocation4], 4294967168 }
 0x347   :  { %488 = vsyncpa [#allocation3], 1 }
 0x348   :  { %489 = vsyncpa [#allocation6], 1 }
 0x349   :  { %490 = vsyncpa [#allocation4], 1 }

</bundles_post_ra>
